<compile_context>
chip_gen: v6e
topology: v6e:2x2x1
jax: 0.10.0
libtpu: 0.0.40
codegen_flags: <defaults>
</compile_context>

<pallas_src>
import math
import numpy as np
import jax
import jax.numpy as jnp
from jax.experimental import pallas as pl
from jax.experimental.pallas import tpu as pltpu


def _round_up(x, m):
    return (x + m - 1) // m * m


def _vmem_capacity_bytes():
    try:
        return int(pltpu.get_tpu_info().vmem_capacity_bytes)
    except Exception:
        return 64 * 1024 * 1024           # conservative fallback (v7x per-TC)


def _fused_gate_add_kernel(x_ref, h_ref, w_in_ref, w_hid_ref, b_ref, o_ref):
    """One (tm, tn) output tile of LinearGateAddMechanism.forward.

    x_ref, h_ref : (tm, H)     row tiles of input / hidden
    w_in_ref     : (2, H, tn)  [Wl1^T ; Wl1^T@W1^T] column tile (pre-fused at init)
    w_hid_ref    : (2, H, tn)  [Wl2^T ; Wl2^T@W2^T] column tile
    b_ref        : (3, tn)     [bl1 ; bl2 ; bl1@W1^T + bl2@W2^T + bias]
    o_ref        : (tm, tn)    output tile
    """
    cdt = w_in_ref.dtype                  # bf16 by default -> native MXU rate
    x = x_ref[...].astype(cdt)
    h = h_ref[...].astype(cdt)

    # Four independent MXU matmuls (no dependency chain), f32 accumulation.
    inp = jnp.dot(x, w_in_ref[0], preferred_element_type=jnp.float32)
    g_x = jnp.dot(x, w_in_ref[1], preferred_element_type=jnp.float32)
    hid = jnp.dot(h, w_hid_ref[0], preferred_element_type=jnp.float32)
    g_h = jnp.dot(h, w_hid_ref[1], preferred_element_type=jnp.float32)

    b = b_ref[...].astype(jnp.float32)
    inp = inp + b[0:1, :]                 # linear1(input)
    hid = hid + b[1:2, :]                 # linear2(hidden)
    gated = g_x + g_h + b[2:3, :]         # inp@W1^T + hid@W2^T + bias

    # sigmoid(z) == 0.5*(tanh(z/2)+1): exact identity, tanh goes to the EUP slot
    # (free filler in an MXU/DMA-bound kernel), no VPU divide.
    gate = 0.5 * (jnp.tanh(0.5 * gated) + 1.0)

    # inp*gate + hid*(1-gate) rewritten as a lerp: saves one VPU mul + one sub.
    o_ref[...] = (hid + gate * (inp - hid)).astype(o_ref.dtype)


def prepare_params(params, *, weight_dtype=jnp.bfloat16):
    """One-time weight fusion / pre-transposition (hoisted out of the per-call path).

    Default bf16 weights: MXU is natively bf16 on all generations and it halves
    weight HBM/VMEM bytes.  Pass weight_dtype=jnp.float32 for exact numerics.
    """
    hp = jax.lax.Precision.HIGHEST
    A1 = params["linear1_w"].T            # x @ A1 == x @ Wl1^T
    A2 = params["linear2_w"].T
    G1 = params["w1"].T
    G2 = params["w2"].T
    P1 = jnp.matmul(A1, G1, precision=hp)  # x @ P1 == (x @ Wl1^T) @ W1^T
    P2 = jnp.matmul(A2, G2, precision=hp)
    w_in = jnp.stack([A1, P1]).astype(weight_dtype)     # (2, H, H)
    w_hid = jnp.stack([A2, P2]).astype(weight_dtype)    # (2, H, H)
    bg = (jnp.matmul(params["linear1_b"], G1, precision=hp)
          + jnp.matmul(params["linear2_b"], G2, precision=hp)
          + params["bias"])
    b = jnp.stack([params["linear1_b"], params["linear2_b"], bg]).astype(jnp.float32)
    return {"w_in": w_in, "w_hid": w_hid, "b": b}


def _choose_tiles(M, H, act_bytes, w_bytes, out_bytes, tm_req, vmem_limit):
    """Pick (tm, tn) so weights + pipelined row/out tiles fit the VMEM budget."""
    w_budget = vmem_limit // 2            # other half: activations/out/intermediates
    if 4 * H * H * w_bytes <= w_budget or H <= 128:
        tn = H                            # weights fully resident, DMA'd once
    else:
        # Column-tiled weights are double-buffered: 2 arrays * (2,H,tn) * 2 bufs.
        tn = (w_budget // (8 * H * w_bytes)) // 128 * 128
        tn = int(max(128, min(tn, H)))
    tm = tm_req
    if tm is None:
        # Bigger row tiles on big-VMEM parts (v5e/v6e) amortize the ~0.35us/step
        # pipeline overhead; keep 256 where VMEM is tight (v7x).
        tm = 512 if (vmem_limit >= 80 * 1024 * 1024 and M >= 2048) else 256
    tm = min(tm, _round_up(M, 8))

    def row_bytes(t):  # x,h (2 bufs each) + out (2 bufs) + ~5 f32 intermediates
        return t * (4 * H * act_bytes + 2 * tn * out_bytes + 5 * tn * 4)

    w_resident = (4 * H * H if tn == H else 8 * H * tn) * w_bytes
    while tm > 8 and w_resident + row_bytes(tm) > vmem_limit:
        tm = _round_up(tm // 2, 8)
    return int(tm), int(tn)


def linear_gate_add(inp, hid, prepared, *, tm=None):
    """inp, hid: (batch, seq, H).  Returns LinearGateAddMechanism(inp, hid)."""
    B, S, H = inp.shape
    M = B * S

    x2 = inp.reshape(M, H)
    h2 = hid.reshape(M, H)
    w_in, w_hid, bias = prepared["w_in"], prepared["w_hid"], prepared["b"]

    act_bytes = x2.dtype.itemsize
    w_bytes = w_in.dtype.itemsize
    out_bytes = inp.dtype.itemsize

    # Generation-aware VMEM budget: ~3/4 of physical per-TC VMEM, capped.
    # v7x (64 MiB physical) -> 48 MiB; v5e/v6e (128 MiB) -> 96 MiB.  Never request
    # the whole physical VMEM: the f32 (tm,tn) matmul results and compiler
    # internal scratch need headroom.
    cap = _vmem_capacity_bytes()
    vmem_limit = max(32 * 1024 * 1024, min(cap * 3 // 4, 96 * 1024 * 1024))

    tm_eff, tn = _choose_tiles(M, H, act_bytes, w_bytes, out_bytes, tm, vmem_limit)

    # No wrapper-side pad/slice: rows (and output columns) are independent, so
    # the clipped partial last blocks are safe (garbage padded rows/cols only
    # produce discarded output elements).
    grid = (pl.cdiv(M, tm_eff), pl.cdiv(H, tn))

    row_spec = pl.BlockSpec((tm_eff, H), lambda i, j: (i, 0))
    out_spec = pl.BlockSpec((tm_eff, tn), lambda i, j: (i, j))

    cost = pl.CostEstimate(
        flops=8 * M * H * H,
        transcendentals=M * H,
        bytes_accessed=int(2 * M * H * act_bytes + M * H * out_bytes
                           + 4 * H * H * w_bytes + 3 * H * 4),
    )

    def run(single_buffer_weights):
        w_kwargs = {}
        if single_buffer_weights:
            # Grid-invariant blocks gain nothing from double buffering; one buffer
            # halves the dominant VMEM term (the resident (2,H,H) weights).
            w_kwargs = dict(pipeline_mode=pl.Buffered(1))
        w_spec = pl.BlockSpec((2, H, tn), lambda i, j: (0, 0, j), **w_kwargs)
        b_spec = pl.BlockSpec((3, tn), lambda i, j: (0, j), **w_kwargs)
        return pl.pallas_call(
            _fused_gate_add_kernel,
            out_shape=jax.ShapeDtypeStruct((M, H), inp.dtype),
            grid_spec=pltpu.PrefetchScalarGridSpec(
                num_scalar_prefetch=0,
                grid=grid,
                in_specs=[row_spec, row_spec, w_spec, w_spec, b_spec],
                out_specs=out_spec,
            ),
            compiler_params=pltpu.CompilerParams(
                # Row tiles are independent -> shard across TCs on v7x.  NOTE: for
                # tiny-M, weight-DMA-bound calls "arbitrary" can win because
                # "parallel" makes each core fetch its own copy of the weights.
                dimension_semantics=("parallel", "arbitrary"),
                vmem_limit_bytes=int(vmem_limit),
            ),
            cost_estimate=cost,
        )(x2, h2, w_in, w_hid, bias)

    single_buffer = (tn == H)   # only when the weight block index never changes
    try:
        out = run(single_buffer)
    except Exception:
        if not single_buffer:
            raise
        out = run(False)        # jax build without BlockSpec pipeline_mode support

    return out.reshape(B, S, H)


def init_params(key, hidden_size):
    """Deterministic init mirroring the PyTorch module's shapes/init ranges."""
    ks = jax.random.split(key, 7)
    H = hidden_size
    lin_std = 1.0 / math.sqrt(H)      # nn.Linear default: U(-1/sqrt(in), 1/sqrt(in))
    stdv1 = 1.0 / math.sqrt(H)
    stdv2 = 1.0 / math.sqrt(H)
    stdv = (stdv1 + stdv2) / 2.0
    u = lambda k, shape, s: jax.random.uniform(k, shape, jnp.float32, -s, s)
    return {
        "linear1_w": u(ks[0], (H, H), lin_std),   # (out, in), like torch
        "linear1_b": u(ks[1], (H,), lin_std),
        "linear2_w": u(ks[2], (H, H), lin_std),
        "linear2_b": u(ks[3], (H,), lin_std),
        "w1": u(ks[4], (H, H), stdv1),
        "w2": u(ks[5], (H, H), stdv2),
        "bias": u(ks[6], (H,), stdv),
    }


def _reference_np(inp, hid, p):
    """float64 numpy reference of LinearGateAddMechanism.forward."""
    x = np.asarray(inp, np.float64)
    h = np.asarray(hid, np.float64)
    w = {k: np.asarray(v, np.float64) for k, v in p.items()}
    a = x @ w["linear1_w"].T + w["linear1_b"]
    b = h @ w["linear2_w"].T + w["linear2_b"]
    gated = a @ w["w1"].T + b @ w["w2"].T + w["bias"]
    gate = 1.0 / (1.0 + np.exp(-gated))
    return a * gate + b * (1.0 - gate)


if __name__ == "__main__":
    key = jax.random.PRNGKey(0)
    k_in, k_hid, k_p = jax.random.split(key, 3)

    batch, seq, hidden = 2, 8, 32
    enc_out = jax.random.normal(k_in, (batch, seq, hidden), jnp.float32)
    kv_out = jax.random.normal(k_hid, (batch, seq, hidden), jnp.float32)
    params = init_params(k_p, hidden)

    ref = _reference_np(enc_out, kv_out, params)

    # TODO(synk): FusionModule's fusion_dropout is identity at inference; training-mode
    # dropout would need pltpu.prng_seed/prng_random_bits in-kernel.  The Highway /
    # style_map fusion branches are not exercised by the 'l-gate-add' configuration.

    # Production path: bf16 matmul operands (native MXU rate, half the HBM bytes).
    prepared = prepare_params(params)                       # bf16 default
    out = jax.block_until_ready(linear_gate_add(enc_out, kv_out, prepared))
    assert out.shape == (batch, seq, hidden)
    assert np.allclose(np.asarray(out, np.float64), ref, atol=5e-2, rtol=5e-2), \
        "bf16 kernel mismatch vs reference"

    # Exactness of the weight-fusion algebra: f32 weights, tight tolerance.
    prepared_f32 = prepare_params(params, weight_dtype=jnp.float32)
    out_f32 = jax.block_until_ready(linear_gate_add(enc_out, kv_out, prepared_f32))
    assert np.allclose(np.asarray(out_f32, np.float64), ref, atol=1e-4, rtol=1e-4), \
        "f32 kernel mismatch vs reference"

    print("KERNEL_OK")
</pallas_src>

<mosaic_0001>
module attributes {stable_mosaic.version = 11 : i64} {
  func.func @_fused_gate_add_kernel(%arg0: i32, %arg1: i32, %arg2: memref<16x32xf32, #tpu.memory_space<vmem>>, %arg3: memref<16x32xf32, #tpu.memory_space<vmem>>, %arg4: memref<2x32x32xbf16, #tpu.memory_space<vmem>>, %arg5: memref<2x32x32xbf16, #tpu.memory_space<vmem>>, %arg6: memref<3x32xf32, #tpu.memory_space<vmem>>, %arg7: memref<16x32xf32, #tpu.memory_space<vmem>>) attributes {dimension_semantics = [#tpu.dimension_semantics<parallel>, #tpu.dimension_semantics<arbitrary>], iteration_bounds = array<i64: 1, 1>, scalar_prefetch = 0 : i64, scratch_operands = 0 : i64, tpu.core_type = #tpu.core_type<tc>, window_params = [{transform_indices = @transform_0, window_bounds = array<i64: 16, 32>}, {transform_indices = @transform_1, window_bounds = array<i64: 16, 32>}, {pipeline_mode = #tpu.pipeline_mode<synchronous>, transform_indices = @transform_2, window_bounds = array<i64: 2, 32, 32>}, {pipeline_mode = #tpu.pipeline_mode<synchronous>, transform_indices = @transform_3, window_bounds = array<i64: 2, 32, 32>}, {pipeline_mode = #tpu.pipeline_mode<synchronous>, transform_indices = @transform_4, window_bounds = array<i64: 3, 32>}, {transform_indices = @transform_5, window_bounds = array<i64: 16, 32>}]} {
    %c0 = arith.constant 0 : index
    %c0_0 = arith.constant 0 : index
    %0 = vector.load %arg2[%c0, %c0_0] : memref<16x32xf32, #tpu.memory_space<vmem>>, vector<16x32xf32>
    %1 = arith.truncf %0 : vector<16x32xf32> to vector<16x32xbf16>
    %c0_1 = arith.constant 0 : index
    %c0_2 = arith.constant 0 : index
    %2 = vector.load %arg3[%c0_1, %c0_2] : memref<16x32xf32, #tpu.memory_space<vmem>>, vector<16x32xf32>
    %3 = arith.truncf %2 : vector<16x32xf32> to vector<16x32xbf16>
    %c0_3 = arith.constant 0 : index
    %c0_4 = arith.constant 0 : index
    %c0_5 = arith.constant 0 : index
    %4 = vector.load %arg4[%c0_3, %c0_4, %c0_5] : memref<2x32x32xbf16, #tpu.memory_space<vmem>>, vector<1x32x32xbf16>
    %5 = vector.shape_cast %4 : vector<1x32x32xbf16> to vector<32x32xbf16>
    %cst = arith.constant dense<0.000000e+00> : vector<16x32xf32>
    %6 = tpu.matmul %1, %5, %cst {dimension_numbers = #tpu.dot_dimension_numbers<[1], [0], [0], [1], [0, 0, 1, 1], [], []>} : vector<16x32xbf16>, vector<32x32xbf16>, vector<16x32xf32> -> vector<16x32xf32>
    %c1 = arith.constant 1 : index
    %c0_6 = arith.constant 0 : index
    %c0_7 = arith.constant 0 : index
    %7 = vector.load %arg4[%c1, %c0_6, %c0_7] : memref<2x32x32xbf16, #tpu.memory_space<vmem>>, vector<1x32x32xbf16>
    %8 = vector.shape_cast %7 : vector<1x32x32xbf16> to vector<32x32xbf16>
    %cst_8 = arith.constant dense<0.000000e+00> : vector<16x32xf32>
    %9 = tpu.matmul %1, %8, %cst_8 {dimension_numbers = #tpu.dot_dimension_numbers<[1], [0], [0], [1], [0, 0, 1, 1], [], []>} : vector<16x32xbf16>, vector<32x32xbf16>, vector<16x32xf32> -> vector<16x32xf32>
    %c0_9 = arith.constant 0 : index
    %c0_10 = arith.constant 0 : index
    %c0_11 = arith.constant 0 : index
    %10 = vector.load %arg5[%c0_9, %c0_10, %c0_11] : memref<2x32x32xbf16, #tpu.memory_space<vmem>>, vector<1x32x32xbf16>
    %11 = vector.shape_cast %10 : vector<1x32x32xbf16> to vector<32x32xbf16>
    %cst_12 = arith.constant dense<0.000000e+00> : vector<16x32xf32>
    %12 = tpu.matmul %3, %11, %cst_12 {dimension_numbers = #tpu.dot_dimension_numbers<[1], [0], [0], [1], [0, 0, 1, 1], [], []>} : vector<16x32xbf16>, vector<32x32xbf16>, vector<16x32xf32> -> vector<16x32xf32>
    %c1_13 = arith.constant 1 : index
    %c0_14 = arith.constant 0 : index
    %c0_15 = arith.constant 0 : index
    %13 = vector.load %arg5[%c1_13, %c0_14, %c0_15] : memref<2x32x32xbf16, #tpu.memory_space<vmem>>, vector<1x32x32xbf16>
    %14 = vector.shape_cast %13 : vector<1x32x32xbf16> to vector<32x32xbf16>
    %cst_16 = arith.constant dense<0.000000e+00> : vector<16x32xf32>
    %15 = tpu.matmul %3, %14, %cst_16 {dimension_numbers = #tpu.dot_dimension_numbers<[1], [0], [0], [1], [0, 0, 1, 1], [], []>} : vector<16x32xbf16>, vector<32x32xbf16>, vector<16x32xf32> -> vector<16x32xf32>
    %c0_17 = arith.constant 0 : index
    %c0_18 = arith.constant 0 : index
    %16 = vector.load %arg6[%c0_17, %c0_18] : memref<3x32xf32, #tpu.memory_space<vmem>>, vector<3x32xf32>
    %17 = vector.extract_strided_slice %16 {offsets = [0, 0], sizes = [1, 32], strides = [1, 1]} : vector<3x32xf32> to vector<1x32xf32>
    %18 = vector.broadcast %17 : vector<1x32xf32> to vector<16x32xf32>
    %19 = arith.addf %6, %18 : vector<16x32xf32>
    %20 = vector.extract_strided_slice %16 {offsets = [1, 0], sizes = [1, 32], strides = [1, 1]} : vector<3x32xf32> to vector<1x32xf32>
    %21 = vector.broadcast %20 : vector<1x32xf32> to vector<16x32xf32>
    %22 = arith.addf %12, %21 : vector<16x32xf32>
    %23 = arith.addf %9, %15 : vector<16x32xf32>
    %24 = vector.extract_strided_slice %16 {offsets = [2, 0], sizes = [1, 32], strides = [1, 1]} : vector<3x32xf32> to vector<1x32xf32>
    %25 = vector.broadcast %24 : vector<1x32xf32> to vector<16x32xf32>
    %26 = arith.addf %23, %25 : vector<16x32xf32>
    %cst_19 = arith.constant 5.000000e-01 : f32
    %27 = vector.broadcast %cst_19 : f32 to vector<16x32xf32>
    %28 = arith.mulf %27, %26 : vector<16x32xf32>
    %29 = math.tanh %28 : vector<16x32xf32>
    %cst_20 = arith.constant 1.000000e+00 : f32
    %30 = vector.broadcast %cst_20 : f32 to vector<16x32xf32>
    %31 = arith.addf %29, %30 : vector<16x32xf32>
    %cst_21 = arith.constant 5.000000e-01 : f32
    %32 = vector.broadcast %cst_21 : f32 to vector<16x32xf32>
    %33 = arith.mulf %32, %31 : vector<16x32xf32>
    %34 = arith.subf %19, %22 : vector<16x32xf32>
    %35 = arith.mulf %33, %34 : vector<16x32xf32>
    %36 = arith.addf %22, %35 : vector<16x32xf32>
    %c0_22 = arith.constant 0 : index
    %c0_23 = arith.constant 0 : index
    %37 = vector.load %arg7[%c0_22, %c0_23] : memref<16x32xf32, #tpu.memory_space<vmem>>, vector<16x32xf32>
    tpu.vector_store %arg7[%c0_22, %c0_23], %36 {strides = array<i32>} : memref<16x32xf32, #tpu.memory_space<vmem>>, vector<16x32xf32>,
    return
  }
  func.func @transform_0(%arg0: i32, %arg1: i32) -> (i32, i32) {
    %c0_i32 = arith.constant 0 : i32
    %c0_i32_0 = arith.constant 0 : i32
    return %arg0, %c0_i32 : i32, i32
  }
  func.func @transform_1(%arg0: i32, %arg1: i32) -> (i32, i32) {
    %c0_i32 = arith.constant 0 : i32
    %c0_i32_0 = arith.constant 0 : i32
    return %arg0, %c0_i32 : i32, i32
  }
  func.func @transform_2(%arg0: i32, %arg1: i32) -> (i32, i32, i32) {
    %c0_i32 = arith.constant 0 : i32
    %c0_i32_0 = arith.constant 0 : i32
    %c0_i32_1 = arith.constant 0 : i32
    return %c0_i32, %c0_i32_0, %arg1 : i32, i32, i32
  }
  func.func @transform_3(%arg0: i32, %arg1: i32) -> (i32, i32, i32) {
    %c0_i32 = arith.constant 0 : i32
    %c0_i32_0 = arith.constant 0 : i32
    %c0_i32_1 = arith.constant 0 : i32
    return %c0_i32, %c0_i32_0, %arg1 : i32, i32, i32
  }
  func.func @transform_4(%arg0: i32, %arg1: i32) -> (i32, i32) {
    %c0_i32 = arith.constant 0 : i32
    %c0_i32_0 = arith.constant 0 : i32
    return %c0_i32, %arg1 : i32, i32
  }
  func.func @transform_5(%arg0: i32, %arg1: i32) -> (i32, i32) {
    %c0_i32 = arith.constant 0 : i32
    return %arg0, %arg1 : i32, i32
  }
}

module attributes {stable_mosaic.version = 11 : i64} {
  func.func @_fused_gate_add_kernel(%arg0: i32, %arg1: i32, %arg2: memref<16x32xf32, #tpu.memory_space<vmem>>, %arg3: memref<16x32xf32, #tpu.memory_space<vmem>>, %arg4: memref<2x32x32xbf16, #tpu.memory_space<vmem>>, %arg5: memref<2x32x32xbf16, #tpu.memory_space<vmem>>, %arg6: memref<3x32xf32, #tpu.memory_space<vmem>>, %arg7: memref<16x32xf32, #tpu.memory_space<vmem>>) attributes {dimension_semantics = [#tpu.dimension_semantics<parallel>, #tpu.dimension_semantics<arbitrary>], iteration_bounds = array<i64: 1, 1>, scalar_prefetch = 0 : i64, scratch_operands = 0 : i64, tpu.core_type = #tpu.core_type<tc>, window_params = [{transform_indices = @transform_0, window_bounds = array<i64: 16, 32>}, {transform_indices = @transform_1, window_bounds = array<i64: 16, 32>}, {transform_indices = @transform_2, window_bounds = array<i64: 2, 32, 32>}, {transform_indices = @transform_3, window_bounds = array<i64: 2, 32, 32>}, {transform_indices = @transform_4, window_bounds = array<i64: 3, 32>}, {transform_indices = @transform_5, window_bounds = array<i64: 16, 32>}]} {
    %c0 = arith.constant 0 : index
    %c0_0 = arith.constant 0 : index
    %0 = vector.load %arg2[%c0, %c0_0] : memref<16x32xf32, #tpu.memory_space<vmem>>, vector<16x32xf32>
    %1 = arith.truncf %0 : vector<16x32xf32> to vector<16x32xbf16>
    %c0_1 = arith.constant 0 : index
    %c0_2 = arith.constant 0 : index
    %2 = vector.load %arg3[%c0_1, %c0_2] : memref<16x32xf32, #tpu.memory_space<vmem>>, vector<16x32xf32>
    %3 = arith.truncf %2 : vector<16x32xf32> to vector<16x32xbf16>
    %c0_3 = arith.constant 0 : index
    %c0_4 = arith.constant 0 : index
    %c0_5 = arith.constant 0 : index
    %4 = vector.load %arg4[%c0_3, %c0_4, %c0_5] : memref<2x32x32xbf16, #tpu.memory_space<vmem>>, vector<1x32x32xbf16>
    %5 = vector.shape_cast %4 : vector<1x32x32xbf16> to vector<32x32xbf16>
    %cst = arith.constant dense<0.000000e+00> : vector<16x32xf32>
    %6 = tpu.matmul %1, %5, %cst {dimension_numbers = #tpu.dot_dimension_numbers<[1], [0], [0], [1], [0, 0, 1, 1], [], []>} : vector<16x32xbf16>, vector<32x32xbf16>, vector<16x32xf32> -> vector<16x32xf32>
    %c1 = arith.constant 1 : index
    %c0_6 = arith.constant 0 : index
    %c0_7 = arith.constant 0 : index
    %7 = vector.load %arg4[%c1, %c0_6, %c0_7] : memref<2x32x32xbf16, #tpu.memory_space<vmem>>, vector<1x32x32xbf16>
    %8 = vector.shape_cast %7 : vector<1x32x32xbf16> to vector<32x32xbf16>
    %cst_8 = arith.constant dense<0.000000e+00> : vector<16x32xf32>
    %9 = tpu.matmul %1, %8, %cst_8 {dimension_numbers = #tpu.dot_dimension_numbers<[1], [0], [0], [1], [0, 0, 1, 1], [], []>} : vector<16x32xbf16>, vector<32x32xbf16>, vector<16x32xf32> -> vector<16x32xf32>
    %c0_9 = arith.constant 0 : index
    %c0_10 = arith.constant 0 : index
    %c0_11 = arith.constant 0 : index
    %10 = vector.load %arg5[%c0_9, %c0_10, %c0_11] : memref<2x32x32xbf16, #tpu.memory_space<vmem>>, vector<1x32x32xbf16>
    %11 = vector.shape_cast %10 : vector<1x32x32xbf16> to vector<32x32xbf16>
    %cst_12 = arith.constant dense<0.000000e+00> : vector<16x32xf32>
    %12 = tpu.matmul %3, %11, %cst_12 {dimension_numbers = #tpu.dot_dimension_numbers<[1], [0], [0], [1], [0, 0, 1, 1], [], []>} : vector<16x32xbf16>, vector<32x32xbf16>, vector<16x32xf32> -> vector<16x32xf32>
    %c1_13 = arith.constant 1 : index
    %c0_14 = arith.constant 0 : index
    %c0_15 = arith.constant 0 : index
    %13 = vector.load %arg5[%c1_13, %c0_14, %c0_15] : memref<2x32x32xbf16, #tpu.memory_space<vmem>>, vector<1x32x32xbf16>
    %14 = vector.shape_cast %13 : vector<1x32x32xbf16> to vector<32x32xbf16>
    %cst_16 = arith.constant dense<0.000000e+00> : vector<16x32xf32>
    %15 = tpu.matmul %3, %14, %cst_16 {dimension_numbers = #tpu.dot_dimension_numbers<[1], [0], [0], [1], [0, 0, 1, 1], [], []>} : vector<16x32xbf16>, vector<32x32xbf16>, vector<16x32xf32> -> vector<16x32xf32>
    %c0_17 = arith.constant 0 : index
    %c0_18 = arith.constant 0 : index
    %16 = vector.load %arg6[%c0_17, %c0_18] : memref<3x32xf32, #tpu.memory_space<vmem>>, vector<3x32xf32>
    %17 = vector.extract_strided_slice %16 {offsets = [0, 0], sizes = [1, 32], strides = [1, 1]} : vector<3x32xf32> to vector<1x32xf32>
    %18 = vector.broadcast %17 : vector<1x32xf32> to vector<16x32xf32>
    %19 = arith.addf %6, %18 : vector<16x32xf32>
    %20 = vector.extract_strided_slice %16 {offsets = [1, 0], sizes = [1, 32], strides = [1, 1]} : vector<3x32xf32> to vector<1x32xf32>
    %21 = vector.broadcast %20 : vector<1x32xf32> to vector<16x32xf32>
    %22 = arith.addf %12, %21 : vector<16x32xf32>
    %23 = arith.addf %9, %15 : vector<16x32xf32>
    %24 = vector.extract_strided_slice %16 {offsets = [2, 0], sizes = [1, 32], strides = [1, 1]} : vector<3x32xf32> to vector<1x32xf32>
    %25 = vector.broadcast %24 : vector<1x32xf32> to vector<16x32xf32>
    %26 = arith.addf %23, %25 : vector<16x32xf32>
    %cst_19 = arith.constant 5.000000e-01 : f32
    %27 = vector.broadcast %cst_19 : f32 to vector<16x32xf32>
    %28 = arith.mulf %27, %26 : vector<16x32xf32>
    %29 = math.tanh %28 : vector<16x32xf32>
    %cst_20 = arith.constant 1.000000e+00 : f32
    %30 = vector.broadcast %cst_20 : f32 to vector<16x32xf32>
    %31 = arith.addf %29, %30 : vector<16x32xf32>
    %cst_21 = arith.constant 5.000000e-01 : f32
    %32 = vector.broadcast %cst_21 : f32 to vector<16x32xf32>
    %33 = arith.mulf %32, %31 : vector<16x32xf32>
    %34 = arith.subf %19, %22 : vector<16x32xf32>
    %35 = arith.mulf %33, %34 : vector<16x32xf32>
    %36 = arith.addf %22, %35 : vector<16x32xf32>
    %c0_22 = arith.constant 0 : index
    %c0_23 = arith.constant 0 : index
    %37 = vector.load %arg7[%c0_22, %c0_23] : memref<16x32xf32, #tpu.memory_space<vmem>>, vector<16x32xf32>
    tpu.vector_store %arg7[%c0_22, %c0_23], %36 {strides = array<i32>} : memref<16x32xf32, #tpu.memory_space<vmem>>, vector<16x32xf32>,
    return
  }
  func.func @transform_0(%arg0: i32, %arg1: i32) -> (i32, i32) {
    %c0_i32 = arith.constant 0 : i32
    %c0_i32_0 = arith.constant 0 : i32
    return %arg0, %c0_i32 : i32, i32
  }
  func.func @transform_1(%arg0: i32, %arg1: i32) -> (i32, i32) {
    %c0_i32 = arith.constant 0 : i32
    %c0_i32_0 = arith.constant 0 : i32
    return %arg0, %c0_i32 : i32, i32
  }
  func.func @transform_2(%arg0: i32, %arg1: i32) -> (i32, i32, i32) {
    %c0_i32 = arith.constant 0 : i32
    %c0_i32_0 = arith.constant 0 : i32
    %c0_i32_1 = arith.constant 0 : i32
    return %c0_i32, %c0_i32_0, %arg1 : i32, i32, i32
  }
  func.func @transform_3(%arg0: i32, %arg1: i32) -> (i32, i32, i32) {
    %c0_i32 = arith.constant 0 : i32
    %c0_i32_0 = arith.constant 0 : i32
    %c0_i32_1 = arith.constant 0 : i32
    return %c0_i32, %c0_i32_0, %arg1 : i32, i32, i32
  }
  func.func @transform_4(%arg0: i32, %arg1: i32) -> (i32, i32) {
    %c0_i32 = arith.constant 0 : i32
    %c0_i32_0 = arith.constant 0 : i32
    return %c0_i32, %arg1 : i32, i32
  }
  func.func @transform_5(%arg0: i32, %arg1: i32) -> (i32, i32) {
    %c0_i32 = arith.constant 0 : i32
    return %arg0, %arg1 : i32, i32
  }
}

</mosaic_0001>

<bundles_post_ra>
// kernel: tpu_custom_call.1
= control target key start
LH: loop header
LB: loop body
LE: loop exit
PB: predicated region body
PF: predicated region fallthrough
CT: control target
= control target key end

     0   :  { %10 = vsyncpa [#allocation3], 0  ;;  %s635_s0 = inlined_call_operand.hbm [shape: f32[16,32], index: 0, kind: input, shape index: {}]   ;;  %s636_s1 = inlined_call_operand.hbm [shape: f32[16,32], index: 1, kind: input, shape index: {}]   ;;  %s637_s2 = inlined_call_operand.hbm [shape: bf16[2,32,32], index: 2, kind: input, shape index: {}]   ;;  %s638_s3 = inlined_call_operand.hbm [shape: bf16[2,32,32], index: 3, kind: input, shape index: {}]   ;;  %s639_s4 = inlined_call_operand.vmem [shape: f32[3,32], index: 4, kind: input, shape index: {}]   ;;  %s640_s5 = inlined_call_operand.hbm [shape: f32[16,32], index: 5, kind: output, shape index: {}]  }
   0x1   :  { %11 = vsyncpa [#allocation6], 0 }
   0x2   :  { %12 = vsyncpa [#allocation9], 0 }
   0x3   :  { %13 = vsyncpa [#allocation4], 0  ;;  %s557_s18 = smov [#allocation5]   ;;  %s558_s20 = smov [#allocation2]  }
   0x4   :  { %s31_s19 = sshll.u32 %s557_s18, 4  ;;  %s19_s21 = sshll.u32 %s558_s20, 4  ;;  %s32_s19 = int_to_ptr.vmem [resolvable:$true] %s31_s19  ;;  %s20_s21 = int_to_ptr.vmem [resolvable:$true] %s19_s21 }
   0x5   :  { %s457_s22 = scalar_lea.vmem %s32_s19, 256  ;;  %p462_p1 = scmp.lt.s32.totalorder %s32_s19, %s32_s19 }
   0x6   :  { %p458_p0 = scmp.ne.s32.totalorder %s32_s19, %s457_s22  ;;  %p463_p2 = scmp.lt.s32.totalorder %s457_s22, %s457_s22 }
   0x8   :  { %p464_p3 = por %p463_p2, %p462_p1 }
   0xa   :  { %p465_p4 = pnand %p464_p3, %p458_p0 }
   0xc   :  { %468 = shalt.err (!%p465_p4)
}
   0xd   :  { %s559_s23 = smov 128   ;;  %s560_s24 = smov 8  }
   0xe   :  { %37 = dma.hbm_to_vmem [thread:$0]  %s636_s1, 256, %s32_s19, [#allocation6], %s559_s23, %s559_s23, %s560_s24  }
   0xf   :  { %s477_s27 = scalar_lea.vmem %s20_s21, 256  ;;  %p482_p6 = scmp.lt.s32.totalorder %s20_s21, %s20_s21 }
  0x10   :  { %p478_p5 = scmp.ne.s32.totalorder %s20_s21, %s477_s27  ;;  %p483_p7 = scmp.lt.s32.totalorder %s477_s27, %s477_s27 }
  0x12   :  { %p484_p8 = por %p483_p7, %p482_p6 }
  0x14   :  { %p485_p9 = pnand %p484_p8, %p478_p5 }
  0x16   :  { %488 = shalt.err (!%p485_p9)
}
  0x17   :  { %25 = dma.hbm_to_vmem [thread:$0]  %s635_s0, 256, %s20_s21, [#allocation3], %s559_s23, %s559_s23, %s560_s24  }
  0x18   :  { %s561_s30 = smov [#allocation7]  }
  0x19   :  { %s43_s6 = sshll.u32 %s561_s30, 4  ;;  %s44_s6 = int_to_ptr.vmem [resolvable:$true] %s43_s6 }
  0x1a   :  { %s497_s7 = scalar_lea.vmem %s44_s6, 512  ;;  %p502_p11 = scmp.lt.s32.totalorder %s44_s6, %s44_s6 }
  0x1b   :  { %p498_p10 = scmp.ne.s32.totalorder %s44_s6, %s497_s7  ;;  %p503_p12 = scmp.lt.s32.totalorder %s497_s7, %s497_s7 }
  0x1d   :  { %p504_p13 = por %p503_p12, %p502_p11 }
  0x1f   :  { %p505_p0 = pnand %p504_p13, %p498_p10 }
  0x21   :  { %508 = shalt.err (!%p505_p0)
}
  0x22   :  { %s562_s1 = smov 64   ;;  %s563_s8 = smov 4  }
  0x23   :  { %49 = dma.hbm_to_vmem [thread:$0]  %s637_s2, 512, %s44_s6, [#allocation6], %s562_s1, %s562_s1, %s563_s8  }
  0x24   :  { %s564_s11 = smov [#allocation8]  }
  0x25   :  { %s55_s12 = sshll.u32 %s564_s11, 4  ;;  %s56_s12 = int_to_ptr.vmem [resolvable:$true] %s55_s12 }
  0x26   :  { %s517_s0 = scalar_lea.vmem %s56_s12, 512  ;;  %p522_p2 = scmp.lt.s32.totalorder %s56_s12, %s56_s12 }
  0x27   :  { %p518_p1 = scmp.ne.s32.totalorder %s56_s12, %s517_s0  ;;  %p523_p3 = scmp.lt.s32.totalorder %s517_s0, %s517_s0 }
  0x29   :  { %p524_p4 = por %p523_p3, %p522_p2 }
  0x2b   :  { %p525_p5 = pnand %p524_p4, %p518_p1 }
  0x2d   :  { %528 = shalt.err (!%p525_p5)
}
  0x2e   :  { %61 = dma.hbm_to_vmem [thread:$0]  %s638_s3, 512, %s56_s12, [#allocation9], %s562_s1, %s562_s1, %s563_s8  }
  0x2f   :  { %549 = dma.done.wait [#allocation3], 256  }
  0x30   :  { %550 = vsyncadd [#allocation3], 4294967040 }
  0x31   :  { %551 = dma.done.wait [#allocation6], 768  }
  0x32   :  { %552 = vsyncadd [#allocation6], 4294966528 }
  0x33   :  { %553 = dma.done.wait [#allocation9], 512  }
  0x34   :  { %554 = vsyncadd [#allocation9], 4294966784  ;;  %v565_v0 = vmov 0.0   ;;  %vm566_vm0 = vmmov 0   ;;  %v437_v1 = vld [vmem:[#allocation8 + $0x18] sm:$0xff]   ;;  %v438_v2 = vld [vmem:[#allocation7 + $0x8] sm:$0xff]   ;;  %v159_v15 = vlaneseq }
  0x35   :  { %394 = vmatprep.subr.bf16.mxu0 %v565_v0  ;;  %402 = vmatprep.subr.bf16.mxu1 %v565_v0  ;;  %v439_v3 = vld [vmem:[#allocation8 + $0x10] sm:$0xff]   ;;  %v440_v4 = vld [vmem:[#allocation7] sm:$0xff]   ;;  %v81_v6 = vld [vmem:[#allocation5 + $0x8] sm:$0xff]  ;;  %vm113_vm1 = vcmask 261120  }
  0x36   :  { %398 = vmatprep.mubr.msk.bf16.mxu0 %vm566_vm0, %v565_v0  ;;  %406 = vmatprep.mubr.msk.bf16.mxu1 %vm566_vm0, %v565_v0  ;;  %v80_v5 = vld [vmem:[#allocation5] sm:$0xff]  ;;  %v77_v7 = vld [vmem:[#allocation2] sm:$0xff]  ;;  %v78_v9 = vld [vmem:[#allocation2 + $0x8] sm:$0xff]  ;;  %v160_v18 = vshrl.u32 %v159_v15, 7 }
  0x37   :  { %395 = vmatpush3.bf16.msra.mxu0 %v437_v1  ;;  %403 = vmatpush3.bf16.msra.mxu1 %v438_v2  ;;  %v82_v8 = vpack.c.bf16 %v81_v6, %v80_v5  ;;  %v79_v10 = vpack.c.bf16 %v78_v9, %v77_v7  ;;  %v441_v11 = vld [vmem:[#allocation8 + $0x8] sm:$0xff]   ;;  %v442_v12 = vld [vmem:[#allocation7 + $0x18] sm:$0xff]   ;;  %v443_v13 = vld [vmem:[#allocation8] sm:$0xff]  }
  0x38   :  { %396 = vmatprep.subr.bf16.mxu0 %v565_v0  ;;  %404 = vmatprep.subr.bf16.mxu1 %v565_v0  ;;  %v444_v14 = vld [vmem:[#allocation7 + $0x10] sm:$0xff]   ;;  %v331_v22 = vsub.s32 2, %v160_v18  ;;  %v158_v25 = vld [vmem:[%s639_s4] sm:$0x7]  ;;  %v221_v42 = vsub.s32 1, %v160_v18  ;;  %v161_v43 = vsub.s32 0, %v160_v18 }
  0x39   :  { %s567_s4 = smov [#allocation10]  }
  0x3a   :  { %v332_v28 = vrot.slane %v158_v25, %v331_v22  ;;  %v222_v44 = vrot.slane %v158_v25, %v221_v42  ;;  %v162_v45 = vrot.slane %v158_v25, %v161_v43  ;;  %s356_s15 = sshll.u32 %s567_s4, 4  ;;  %s357_s15 = int_to_ptr.vmem [resolvable:$true] %s356_s15 }
  0x3b   :  { %397 = vmatpush3.bf16.msra.mxu0 %v439_v3  ;;  %405 = vmatpush3.bf16.msra.mxu1 %v440_v4  ;;  %s529_s16 = scalar_lea.vmem %s357_s15, 256  ;;  %p534_p7 = scmp.lt.s32.totalorder %s357_s15, %s357_s15 }
  0x3c   :  { %410 = vmatprep.subr.bf16.mxu0 %v565_v0  ;;  %418 = vmatprep.subr.bf16.mxu1 %v565_v0  ;;  %p530_p6 = scmp.ne.s32.totalorder %s357_s15, %s529_s16  ;;  %p535_p8 = scmp.lt.s32.totalorder %s529_s16, %s529_s16 }
  0x3e   :  { %399 = vmatmul.mubr.msk.bf16.vlgmr.msra.gmra.mxu0 %vm113_vm1, %v82_v8  ;;  %407 = vmatmul.mubr.msk.bf16.vlgmr.msra.gmra.mxu1 %vm113_vm1, %v79_v10  ;;  %p536_p9 = por %p535_p8, %p534_p7 }
  0x3f   :  { %411 = vmatpush3.bf16.msra.mxu0 %v441_v11  ;;  %419 = vmatpush3.bf16.msra.mxu1 %v442_v12 }
  0x40   :  { %412 = vmatprep.subr.bf16.mxu0 %v565_v0  ;;  %420 = vmatprep.subr.bf16.mxu1 %v565_v0  ;;  %p537_p10 = pnand %p536_p9, %p530_p6 }
  0x41   :  { %414 = vmatprep.mubr.msk.bf16.mxu0 %vm566_vm0, %v565_v0  ;;  %422 = vmatprep.mubr.msk.bf16.mxu1 %vm566_vm0, %v565_v0 }
  0x43   :  { %413 = vmatpush3.bf16.msra.mxu0 %v443_v13  ;;  %421 = vmatpush3.bf16.msra.mxu1 %v444_v14 }
  0x46   :  { %415 = vmatmul.mubr.msk.bf16.vlgmr.msra.gmra.mxu0 %vm113_vm1, %v82_v8  ;;  %423 = vmatmul.mubr.msk.bf16.vlgmr.msra.gmra.mxu1 %vm113_vm1, %v79_v10 }
  0xfe   :  { %v151_v16 = vpop.f32.mrf.mxu0  ;;  %v212_v17 = vpop.f32.mrf.mxu1 }
  0xff   :  { %v213_v48 = vadd.f32 %v212_v17, %v162_v45 }
 0x100   :  { %v400_v19 = vpop.f32.mrf.mxu0  ;;  %v408_v20 = vpop.f32.mrf.mxu1 }
 0x102   :  { %v154_v21 = vpop.f32.mrf.mxu0  ;;  %v215_v23 = vpop.f32.mrf.mxu1 }
 0x103   :  { %v216_v54 = vadd.f32 %v215_v23, %v162_v45 }
 0x104   :  { %v401_v24 = vpop.f32.mrf.mxu0  ;;  %v409_v26 = vpop.f32.mrf.mxu1 }
 0x106   :  { %v269_v27 = vpop.f32.mrf.mxu0  ;;  %v322_v29 = vpop.f32.mrf.mxu1 }
 0x107   :  { %v323_v30 = vadd.f32 %v322_v29, %v151_v16  ;;  %v270_v46 = vadd.f32 %v269_v27, %v222_v44 }
 0x108   :  { %v416_v31 = vpop.f32.mrf.mxu0  ;;  %v424_v32 = vpop.f32.mrf.mxu1 }
 0x109   :  { %v333_v33 = vadd.f32 %v332_v28, %v323_v30  ;;  %v343_v50 = vsub.f32 %v213_v48, %v270_v46 }
 0x10a   :  { %v272_v34 = vpop.f32.mrf.mxu0  ;;  %v325_v35 = vpop.f32.mrf.mxu1 }
 0x10b   :  { %v335_v36 = vmul.f32 0.5, %v333_v33  ;;  %v326_v37 = vadd.f32 %v325_v35, %v154_v21  ;;  %v273_v52 = vadd.f32 %v272_v34, %v222_v44 }
 0x10c   :  { %v417_v38 = vpop.f32.mrf.mxu0  ;;  %v425_v39 = vpop.f32.mrf.mxu1 }
 0x10d   :  { %445 = vtanh.f32 %v335_v36  ;;  %v334_v40 = vadd.f32 %v332_v28, %v326_v37  ;;  %v344_v57 = vsub.f32 %v216_v54, %v273_v52 }
 0x10f   :  { %v336_v41 = vmul.f32 0.5, %v334_v40 }
 0x111   :  { %447 = vtanh.f32 %v336_v41 }
 0x11a   :  { %v446_v47 = vpop.eup %445 }
 0x11b   :  { %v339_v49 = vadd.f32 1.0, %v446_v47 }
 0x11d   :  { %v341_v51 = vmul.f32 0.5, %v339_v49 }
 0x11e   :  { %v448_v53 = vpop.eup %447 }
 0x11f   :  { %v345_v55 = vmul.f32 %v343_v50, %v341_v51  ;;  %v340_v56 = vadd.f32 1.0, %v448_v53 }
 0x121   :  { %v342_v58 = vmul.f32 0.5, %v340_v56  ;;  %v347_v59 = vadd.f32 %v345_v55, %v270_v46 }
 0x123   :  { %v346_v60 = vmul.f32 %v344_v57, %v342_v58  ;;  %349 = vst.msk [vmem:[#allocation10] sm:$0xff] %vm113_vm1, %v347_v59 }
 0x125   :  { %v348_v61 = vadd.f32 %v346_v60, %v273_v52 }
 0x127   :  { %350 = vst.msk [vmem:[#allocation10 + $0x8] sm:$0xff] %vm113_vm1, %v348_v61 }
 0x128   :  { %540 = shalt.err (!%p537_p10)
}
 0x129   :  { %362 = dma.vmem_to_hbm [thread:$0]  %s357_s15, 256, %s640_s5, [#allocation4], %s559_s23, %s559_s23, %s560_s24  }
 0x12a   :  { %555 = dma.done.wait [#allocation4], 256  }
 0x12b   :  { %556 = vsyncadd [#allocation4], 4294967040 }
 0x12c   :  { %366 = vsyncpa [#allocation3], 1 }
 0x12d   :  { %367 = vsyncpa [#allocation6], 1 }
 0x12e   :  { %368 = vsyncpa [#allocation9], 1 }
 0x12f   :  { %369 = vsyncpa [#allocation4], 1 }

// kernel: tpu_custom_call.1
= control target key start
LH: loop header
LB: loop body
LE: loop exit
PB: predicated region body
PF: predicated region fallthrough
CT: control target
= control target key end

     0   :  { %10 = vsyncpa [#allocation3], 0  ;;  %s635_s0 = inlined_call_operand.hbm [shape: f32[16,32], index: 0, kind: input, shape index: {}]   ;;  %s636_s1 = inlined_call_operand.hbm [shape: f32[16,32], index: 1, kind: input, shape index: {}]   ;;  %s637_s2 = inlined_call_operand.hbm [shape: bf16[2,32,32], index: 2, kind: input, shape index: {}]   ;;  %s638_s3 = inlined_call_operand.hbm [shape: bf16[2,32,32], index: 3, kind: input, shape index: {}]   ;;  %s639_s4 = inlined_call_operand.vmem [shape: f32[3,32], index: 4, kind: input, shape index: {}]   ;;  %s640_s5 = inlined_call_operand.hbm [shape: f32[16,32], index: 5, kind: output, shape index: {}]  }
   0x1   :  { %11 = vsyncpa [#allocation6], 0 }
   0x2   :  { %12 = vsyncpa [#allocation9], 0 }
   0x3   :  { %13 = vsyncpa [#allocation4], 0  ;;  %s557_s18 = smov [#allocation5]   ;;  %s558_s20 = smov [#allocation2]  }
   0x4   :  { %s31_s19 = sshll.u32 %s557_s18, 4  ;;  %s19_s21 = sshll.u32 %s558_s20, 4  ;;  %s32_s19 = int_to_ptr.vmem [resolvable:$true] %s31_s19  ;;  %s20_s21 = int_to_ptr.vmem [resolvable:$true] %s19_s21 }
   0x5   :  { %s457_s22 = scalar_lea.vmem %s32_s19, 256  ;;  %p462_p1 = scmp.lt.s32.totalorder %s32_s19, %s32_s19 }
   0x6   :  { %p458_p0 = scmp.ne.s32.totalorder %s32_s19, %s457_s22  ;;  %p463_p2 = scmp.lt.s32.totalorder %s457_s22, %s457_s22 }
   0x8   :  { %p464_p3 = por %p463_p2, %p462_p1 }
   0xa   :  { %p465_p4 = pnand %p464_p3, %p458_p0 }
   0xc   :  { %468 = shalt.err (!%p465_p4)
}
   0xd   :  { %s559_s23 = smov 128   ;;  %s560_s24 = smov 8  }
   0xe   :  { %37 = dma.hbm_to_vmem [thread:$0]  %s636_s1, 256, %s32_s19, [#allocation6], %s559_s23, %s559_s23, %s560_s24  }
   0xf   :  { %s477_s27 = scalar_lea.vmem %s20_s21, 256  ;;  %p482_p6 = scmp.lt.s32.totalorder %s20_s21, %s20_s21 }
  0x10   :  { %p478_p5 = scmp.ne.s32.totalorder %s20_s21, %s477_s27  ;;  %p483_p7 = scmp.lt.s32.totalorder %s477_s27, %s477_s27 }
  0x12   :  { %p484_p8 = por %p483_p7, %p482_p6 }
  0x14   :  { %p485_p9 = pnand %p484_p8, %p478_p5 }
  0x16   :  { %488 = shalt.err (!%p485_p9)
}
  0x17   :  { %25 = dma.hbm_to_vmem [thread:$0]  %s635_s0, 256, %s20_s21, [#allocation3], %s559_s23, %s559_s23, %s560_s24  }
  0x18   :  { %s561_s30 = smov [#allocation7]  }
  0x19   :  { %s43_s6 = sshll.u32 %s561_s30, 4  ;;  %s44_s6 = int_to_ptr.vmem [resolvable:$true] %s43_s6 }
  0x1a   :  { %s497_s7 = scalar_lea.vmem %s44_s6, 512  ;;  %p502_p11 = scmp.lt.s32.totalorder %s44_s6, %s44_s6 }
  0x1b   :  { %p498_p10 = scmp.ne.s32.totalorder %s44_s6, %s497_s7  ;;  %p503_p12 = scmp.lt.s32.totalorder %s497_s7, %s497_s7 }
  0x1d   :  { %p504_p13 = por %p503_p12, %p502_p11 }
  0x1f   :  { %p505_p0 = pnand %p504_p13, %p498_p10 }
  0x21   :  { %508 = shalt.err (!%p505_p0)
}
  0x22   :  { %s562_s1 = smov 64   ;;  %s563_s8 = smov 4  }
  0x23   :  { %49 = dma.hbm_to_vmem [thread:$0]  %s637_s2, 512, %s44_s6, [#allocation6], %s562_s1, %s562_s1, %s563_s8  }
  0x24   :  { %s564_s11 = smov [#allocation8]  }
  0x25   :  { %s55_s12 = sshll.u32 %s564_s11, 4  ;;  %s56_s12 = int_to_ptr.vmem [resolvable:$true] %s55_s12 }
  0x26   :  { %s517_s0 = scalar_lea.vmem %s56_s12, 512  ;;  %p522_p2 = scmp.lt.s32.totalorder %s56_s12, %s56_s12 }
  0x27   :  { %p518_p1 = scmp.ne.s32.totalorder %s56_s12, %s517_s0  ;;  %p523_p3 = scmp.lt.s32.totalorder %s517_s0, %s517_s0 }
  0x29   :  { %p524_p4 = por %p523_p3, %p522_p2 }
  0x2b   :  { %p525_p5 = pnand %p524_p4, %p518_p1 }
  0x2d   :  { %528 = shalt.err (!%p525_p5)
}
  0x2e   :  { %61 = dma.hbm_to_vmem [thread:$0]  %s638_s3, 512, %s56_s12, [#allocation9], %s562_s1, %s562_s1, %s563_s8  }
  0x2f   :  { %549 = dma.done.wait [#allocation3], 256  }
  0x30   :  { %550 = vsyncadd [#allocation3], 4294967040 }
  0x31   :  { %551 = dma.done.wait [#allocation6], 768  }
  0x32   :  { %552 = vsyncadd [#allocation6], 4294966528 }
  0x33   :  { %553 = dma.done.wait [#allocation9], 512  }
  0x34   :  { %554 = vsyncadd [#allocation9], 4294966784  ;;  %v565_v0 = vmov 0.0   ;;  %vm566_vm0 = vmmov 0   ;;  %v437_v1 = vld [vmem:[#allocation8 + $0x18] sm:$0xff]   ;;  %v438_v2 = vld [vmem:[#allocation7 + $0x8] sm:$0xff]   ;;  %v159_v15 = vlaneseq }
  0x35   :  { %394 = vmatprep.subr.bf16.mxu0 %v565_v0  ;;  %402 = vmatprep.subr.bf16.mxu1 %v565_v0  ;;  %v439_v3 = vld [vmem:[#allocation8 + $0x10] sm:$0xff]   ;;  %v440_v4 = vld [vmem:[#allocation7] sm:$0xff]   ;;  %v81_v6 = vld [vmem:[#allocation5 + $0x8] sm:$0xff]  ;;  %vm113_vm1 = vcmask 261120  }
  0x36   :  { %398 = vmatprep.mubr.msk.bf16.mxu0 %vm566_vm0, %v565_v0  ;;  %406 = vmatprep.mubr.msk.bf16.mxu1 %vm566_vm0, %v565_v0  ;;  %v80_v5 = vld [vmem:[#allocation5] sm:$0xff]  ;;  %v77_v7 = vld [vmem:[#allocation2] sm:$0xff]  ;;  %v78_v9 = vld [vmem:[#allocation2 + $0x8] sm:$0xff]  ;;  %v160_v18 = vshrl.u32 %v159_v15, 7 }
  0x37   :  { %395 = vmatpush3.bf16.msra.mxu0 %v437_v1  ;;  %403 = vmatpush3.bf16.msra.mxu1 %v438_v2  ;;  %v82_v8 = vpack.c.bf16 %v81_v6, %v80_v5  ;;  %v79_v10 = vpack.c.bf16 %v78_v9, %v77_v7  ;;  %v441_v11 = vld [vmem:[#allocation8 + $0x8] sm:$0xff]   ;;  %v442_v12 = vld [vmem:[#allocation7 + $0x18] sm:$0xff]   ;;  %v443_v13 = vld [vmem:[#allocation8] sm:$0xff]  }
  0x38   :  { %396 = vmatprep.subr.bf16.mxu0 %v565_v0  ;;  %404 = vmatprep.subr.bf16.mxu1 %v565_v0  ;;  %v444_v14 = vld [vmem:[#allocation7 + $0x10] sm:$0xff]   ;;  %v331_v22 = vsub.s32 2, %v160_v18  ;;  %v158_v25 = vld [vmem:[%s639_s4] sm:$0x7]  ;;  %v221_v42 = vsub.s32 1, %v160_v18  ;;  %v161_v43 = vsub.s32 0, %v160_v18 }
  0x39   :  { %s567_s4 = smov [#allocation10]  }
  0x3a   :  { %v332_v28 = vrot.slane %v158_v25, %v331_v22  ;;  %v222_v44 = vrot.slane %v158_v25, %v221_v42  ;;  %v162_v45 = vrot.slane %v158_v25, %v161_v43  ;;  %s356_s15 = sshll.u32 %s567_s4, 4  ;;  %s357_s15 = int_to_ptr.vmem [resolvable:$true] %s356_s15 }
  0x3b   :  { %397 = vmatpush3.bf16.msra.mxu0 %v439_v3  ;;  %405 = vmatpush3.bf16.msra.mxu1 %v440_v4  ;;  %s529_s16 = scalar_lea.vmem %s357_s15, 256  ;;  %p534_p7 = scmp.lt.s32.totalorder %s357_s15, %s357_s15 }
  0x3c   :  { %410 = vmatprep.subr.bf16.mxu0 %v565_v0  ;;  %418 = vmatprep.subr.bf16.mxu1 %v565_v0  ;;  %p530_p6 = scmp.ne.s32.totalorder %s357_s15, %s529_s16  ;;  %p535_p8 = scmp.lt.s32.totalorder %s529_s16, %s529_s16 }
  0x3e   :  { %399 = vmatmul.mubr.msk.bf16.vlgmr.msra.gmra.mxu0 %vm113_vm1, %v82_v8  ;;  %407 = vmatmul.mubr.msk.bf16.vlgmr.msra.gmra.mxu1 %vm113_vm1, %v79_v10  ;;  %p536_p9 = por %p535_p8, %p534_p7 }
  0x3f   :  { %411 = vmatpush3.bf16.msra.mxu0 %v441_v11  ;;  %419 = vmatpush3.bf16.msra.mxu1 %v442_v12 }
  0x40   :  { %412 = vmatprep.subr.bf16.mxu0 %v565_v0  ;;  %420 = vmatprep.subr.bf16.mxu1 %v565_v0  ;;  %p537_p10 = pnand %p536_p9, %p530_p6 }
  0x41   :  { %414 = vmatprep.mubr.msk.bf16.mxu0 %vm566_vm0, %v565_v0  ;;  %422 = vmatprep.mubr.msk.bf16.mxu1 %vm566_vm0, %v565_v0 }
  0x43   :  { %413 = vmatpush3.bf16.msra.mxu0 %v443_v13  ;;  %421 = vmatpush3.bf16.msra.mxu1 %v444_v14 }
  0x46   :  { %415 = vmatmul.mubr.msk.bf16.vlgmr.msra.gmra.mxu0 %vm113_vm1, %v82_v8  ;;  %423 = vmatmul.mubr.msk.bf16.vlgmr.msra.gmra.mxu1 %vm113_vm1, %v79_v10 }
  0xfe   :  { %v151_v16 = vpop.f32.mrf.mxu0  ;;  %v212_v17 = vpop.f32.mrf.mxu1 }
  0xff   :  { %v213_v48 = vadd.f32 %v212_v17, %v162_v45 }
 0x100   :  { %v400_v19 = vpop.f32.mrf.mxu0  ;;  %v408_v20 = vpop.f32.mrf.mxu1 }
 0x102   :  { %v154_v21 = vpop.f32.mrf.mxu0  ;;  %v215_v23 = vpop.f32.mrf.mxu1 }
 0x103   :  { %v216_v54 = vadd.f32 %v215_v23, %v162_v45 }
 0x104   :  { %v401_v24 = vpop.f32.mrf.mxu0  ;;  %v409_v26 = vpop.f32.mrf.mxu1 }
 0x106   :  { %v269_v27 = vpop.f32.mrf.mxu0  ;;  %v322_v29 = vpop.f32.mrf.mxu1 }
 0x107   :  { %v323_v30 = vadd.f32 %v322_v29, %v151_v16  ;;  %v270_v46 = vadd.f32 %v269_v27, %v222_v44 }
 0x108   :  { %v416_v31 = vpop.f32.mrf.mxu0  ;;  %v424_v32 = vpop.f32.mrf.mxu1 }
 0x109   :  { %v333_v33 = vadd.f32 %v332_v28, %v323_v30  ;;  %v343_v50 = vsub.f32 %v213_v48, %v270_v46 }
 0x10a   :  { %v272_v34 = vpop.f32.mrf.mxu0  ;;  %v325_v35 = vpop.f32.mrf.mxu1 }
 0x10b   :  { %v335_v36 = vmul.f32 0.5, %v333_v33  ;;  %v326_v37 = vadd.f32 %v325_v35, %v154_v21  ;;  %v273_v52 = vadd.f32 %v272_v34, %v222_v44 }
 0x10c   :  { %v417_v38 = vpop.f32.mrf.mxu0  ;;  %v425_v39 = vpop.f32.mrf.mxu1 }
 0x10d   :  { %445 = vtanh.f32 %v335_v36  ;;  %v334_v40 = vadd.f32 %v332_v28, %v326_v37  ;;  %v344_v57 = vsub.f32 %v216_v54, %v273_v52 }
 0x10f   :  { %v336_v41 = vmul.f32 0.5, %v334_v40 }
 0x111   :  { %447 = vtanh.f32 %v336_v41 }
 0x11a   :  { %v446_v47 = vpop.eup %445 }
 0x11b   :  { %v339_v49 = vadd.f32 1.0, %v446_v47 }
 0x11d   :  { %v341_v51 = vmul.f32 0.5, %v339_v49 }
 0x11e   :  { %v448_v53 = vpop.eup %447 }
 0x11f   :  { %v345_v55 = vmul.f32 %v343_v50, %v341_v51  ;;  %v340_v56 = vadd.f32 1.0, %v448_v53 }
 0x121   :  { %v342_v58 = vmul.f32 0.5, %v340_v56  ;;  %v347_v59 = vadd.f32 %v345_v55, %v270_v46 }
 0x123   :  { %v346_v60 = vmul.f32 %v344_v57, %v342_v58  ;;  %349 = vst.msk [vmem:[#allocation10] sm:$0xff] %vm113_vm1, %v347_v59 }
 0x125   :  { %v348_v61 = vadd.f32 %v346_v60, %v273_v52 }
 0x127   :  { %350 = vst.msk [vmem:[#allocation10 + $0x8] sm:$0xff] %vm113_vm1, %v348_v61 }
 0x128   :  { %540 = shalt.err (!%p537_p10)
}
 0x129   :  { %362 = dma.vmem_to_hbm [thread:$0]  %s357_s15, 256, %s640_s5, [#allocation4], %s559_s23, %s559_s23, %s560_s24  }
 0x12a   :  { %555 = dma.done.wait [#allocation4], 256  }
 0x12b   :  { %556 = vsyncadd [#allocation4], 4294967040 }
 0x12c   :  { %366 = vsyncpa [#allocation3], 1 }
 0x12d   :  { %367 = vsyncpa [#allocation6], 1 }
 0x12e   :  { %368 = vsyncpa [#allocation9], 1 }
 0x12f   :  { %369 = vsyncpa [#allocation4], 1 }

</bundles_post_ra>
